<compile_context>
chip_gen: v5e
topology: v5e:2x2
jax: 0.10.0
libtpu: 0.0.40
codegen_flags: <defaults>
</compile_context>

<pallas_src>
import functools
import math

import jax
import jax.numpy as jnp
import numpy as np
from jax.experimental import pallas as pl
from jax.experimental.pallas import tpu as pltpu


def _round_up(x, m):
    return ((x + m - 1) // m) * m


def _bert_output_kernel(x_ref, res_ref, w_ref, p_ref, o_ref, *,
                        eps, d_valid, compute_dtype):
    """One grid step = one (TM, D_pad) output tile.

    x_ref:   (TM, I)      intermediate activations (dense input)
    res_ref: (TM, D_pad)  residual (input_tensor), zero-padded lanes
    w_ref:   (I,  D_pad)  dense weight (pre-transposed), zero-padded lanes
    p_ref:   (8,  D_pad)  packed params: row0 = bias, row1 = gamma, row2 = beta
    o_ref:   (TM, D_pad)  output
    """
    x = x_ref[...]
    if x.dtype != compute_dtype:          # bf16 MXU path: cast tile in-register
        x = x.astype(compute_dtype)

    # Single fused MXU matmul per row tile, f32 accumulation.
    y = jnp.dot(x, w_ref[...], preferred_element_type=jnp.float32)

    bias = p_ref[0:1, :].astype(jnp.float32)
    gamma = p_ref[1:2, :].astype(jnp.float32)
    beta = p_ref[2:3, :].astype(jnp.float32)

    # TODO(synk): training-time dropout (hidden_dropout_prob) not implemented;
    # eval mode => identity.

    # Bias + residual add (padded lanes of bias/residual/weight are zero, so
    # padded columns of y are exactly 0).
    y = y + bias + res_ref[...].astype(jnp.float32)

    # LayerNorm over the *valid* hidden dim (population variance, matching
    # torch.nn.LayerNorm).  Padded lanes contribute 0 to the sum and are
    # masked out of the variance.
    d_pad = y.shape[-1]
    inv_d = 1.0 / float(d_valid)
    mean = jnp.sum(y, axis=-1, keepdims=True) * inv_d
    yc = y - mean
    if d_pad != d_valid:
        lane = jax.lax.broadcasted_iota(jnp.int32, (1, d_pad), 1)
        yc_valid = jnp.where(lane < d_valid, yc, 0.0)
    else:
        yc_valid = yc
    var = jnp.sum(yc_valid * yc_valid, axis=-1, keepdims=True) * inv_d
    inv = jax.lax.rsqrt(var + eps)        # EUP rsqrt (free slot)

    out = yc * inv * gamma + beta
    # Full-width, lane-dense store (D_pad is a multiple of 128).
    o_ref[...] = out.astype(o_ref.dtype)


def bert_output(hidden_states, input_tensor, w_t, b, gamma, beta, *,
                eps=1e-12, row_tile=None, compute_dtype=None):
    """hidden_states: (B, S, I); input_tensor: (B, S, D);
    w_t: (I, D) pre-transposed nn.Linear weight; b/gamma/beta: (D,) or (1, D).

    compute_dtype selects the MXU operand dtype (bf16 recommended on v6e/v7x);
    accumulation and the bias/residual/LayerNorm epilogue stay in f32.
    """
    B, S, I = hidden_states.shape
    D = input_tensor.shape[-1]
    M = B * S

    if compute_dtype is None:
        compute_dtype = hidden_states.dtype
    compute_dtype = jnp.dtype(compute_dtype)
    out_dtype = jnp.dtype(hidden_states.dtype)

    # Physical VMEM per TensorCore; conservative fallback if not queryable.
    try:
        vmem_cap = int(pltpu.get_tpu_info().vmem_capacity_bytes)
    except Exception:
        vmem_cap = 64 * 1024 * 1024       # v7x-sized lower bound
    small_vmem = vmem_cap <= 64 * 1024 * 1024

    # Per-generation row tile: bigger tiles amortize per-grid-step overhead on
    # 128 MiB parts (v5e/v6e); keep them smaller on 64 MiB v7x.
    if row_tile is None:
        if compute_dtype.itemsize <= 2:
            row_tile = 512 if small_vmem else 1024
        else:
            row_tile = 256 if small_vmem else 512

    # ---- padding instead of divisor search ---------------------------------
    # Rows: tile must be a multiple of 8 sublanes; pad M up to full tiles
    # (padded rows are zeros -> finite values, cropped below).
    tm = min(row_tile, _round_up(M, 8))
    M_pad = _round_up(M, tm)
    # Lanes: pad hidden dim to a multiple of 128 so output stores are
    # unmasked full-width vst (real BERT D=768/1024 needs no padding).
    D_pad = _round_up(D, 128)

    x2 = hidden_states.reshape(M, I)
    r2 = input_tensor.reshape(M, D)
    if M_pad != M:
        x2 = jnp.pad(x2, ((0, M_pad - M), (0, 0)))
        r2 = jnp.pad(r2, ((0, M_pad - M), (0, 0)))
    if D_pad != D:
        r2 = jnp.pad(r2, ((0, 0), (0, D_pad - D)))

    # Weight stored once in the MXU dtype (halves weight DMA/VMEM in bf16).
    w_p = w_t.astype(compute_dtype)
    if D_pad != D:
        w_p = jnp.pad(w_p, ((0, 0), (0, D_pad - D)))

    # Pack bias / gamma / beta into a single sublane tile (8, D_pad).
    params = jnp.zeros((8, D_pad), jnp.float32)
    params = params.at[0, :D].set(jnp.asarray(b, jnp.float32).reshape(-1))
    params = params.at[1, :D].set(jnp.asarray(gamma, jnp.float32).reshape(-1))
    params = params.at[2, :D].set(jnp.asarray(beta, jnp.float32).reshape(-1))

    grid = (M_pad // tm,)

    # VMEM budget: weight (assume worst-case double buffering) + double-buffered
    # streamed tiles + params + margin; clamp to 75% of physical VMEM.
    bytes_needed = (2 * w_p.size * w_p.dtype.itemsize
                    + 2 * tm * I * x2.dtype.itemsize
                    + 2 * tm * D_pad * r2.dtype.itemsize
                    + 2 * tm * D_pad * out_dtype.itemsize
                    + 8 * D_pad * 4
                    + (4 << 20))
    vmem_limit = int(min(max(bytes_needed, 32 << 20), int(vmem_cap * 0.75)))

    kernel = functools.partial(_bert_output_kernel, eps=float(eps),
                               d_valid=D, compute_dtype=compute_dtype)
    const = lambda i: (0, 0)

    cost = pl.CostEstimate(
        flops=2 * M_pad * I * D_pad,
        transcendentals=M_pad,
        bytes_accessed=(x2.size * x2.dtype.itemsize
                        + r2.size * r2.dtype.itemsize
                        + w_p.size * w_p.dtype.itemsize
                        + params.size * 4
                        + M_pad * D_pad * out_dtype.itemsize))

    out2 = pl.pallas_call(
        kernel,
        out_shape=jax.ShapeDtypeStruct((M_pad, D_pad), out_dtype),
        grid=grid,
        in_specs=[
            pl.BlockSpec((tm, I), lambda i: (i, 0)),       # activations row tile
            pl.BlockSpec((tm, D_pad), lambda i: (i, 0)),   # residual row tile
            pl.BlockSpec((I, D_pad), const),               # weight (grid-invariant)
            pl.BlockSpec((8, D_pad), const),               # packed bias/gamma/beta
        ],
        out_specs=pl.BlockSpec((tm, D_pad), lambda i: (i, 0)),
        compiler_params=pltpu.CompilerParams(
            dimension_semantics=("parallel",),
            vmem_limit_bytes=vmem_limit),
        cost_estimate=cost,
    )(x2, r2, w_p, params)

    # Crop row/lane padding and restore (B, S, D).
    return out2[:M, :D].reshape(B, S, D)


def _reference(hidden_states, input_tensor, w_t, b, gamma, beta, eps):
    """Pure-JAX mirror of BertOutput.forward (eval mode, do_paths/do_layernorm=True)."""
    y = hidden_states @ w_t + b
    y = y + input_tensor
    mean = jnp.mean(y, axis=-1, keepdims=True)
    var = jnp.mean((y - mean) ** 2, axis=-1, keepdims=True)
    return (y - mean) * jax.lax.rsqrt(var + eps) * gamma + beta


if __name__ == "__main__":
    # Small config consistent with the module:
    #   hidden_size D = 32, intermediate_size I = 4 * D = 128, eps = 1e-12.
    B, S, D = 2, 8, 32
    I = 4 * D
    eps = 1e-12

    key = jax.random.PRNGKey(0)
    ks = jax.random.split(key, 6)

    hidden_states = jax.random.normal(ks[0], (B, S, I), dtype=jnp.float32)
    input_tensor = jax.random.normal(ks[1], (B, S, D), dtype=jnp.float32)

    # nn.Linear(I, D): weight (D, I), bias (D,).  Pass weight pre-transposed.
    w = jax.random.normal(ks[2], (D, I), jnp.float32) / math.sqrt(I)
    w_t = w.T                                        # (I, D) == x @ W layout
    b = jax.random.normal(ks[3], (1, D), jnp.float32) * 0.1
    gamma = 1.0 + 0.1 * jax.random.normal(ks[4], (1, D), jnp.float32)
    beta = 0.1 * jax.random.normal(ks[5], (1, D), jnp.float32)

    ref = _reference(hidden_states, input_tensor, w_t, b, gamma, beta, eps)

    # f32 MXU path (tight tolerance).
    out = bert_output(hidden_states, input_tensor, w_t, b, gamma, beta,
                      eps=eps, compute_dtype=jnp.float32)
    out = jax.block_until_ready(out)
    np.testing.assert_allclose(np.asarray(out), np.asarray(ref),
                               rtol=1e-5, atol=1e-5)

    # bf16 MXU path (production setting for v6e/v7x; f32 accumulation/epilogue).
    out_bf16 = bert_output(hidden_states, input_tensor, w_t, b, gamma, beta,
                           eps=eps, compute_dtype=jnp.bfloat16)
    out_bf16 = jax.block_until_ready(out_bf16)
    np.testing.assert_allclose(np.asarray(out_bf16), np.asarray(ref),
                               rtol=2e-2, atol=2e-2)

    print("KERNEL_OK")
</pallas_src>

<mosaic_0001>
module attributes {stable_mosaic.version = 11 : i64} {
  func.func @_bert_output_kernel(%arg0: i32, %arg1: memref<16x128xf32, #tpu.memory_space<vmem>>, %arg2: memref<16x128xf32, #tpu.memory_space<vmem>>, %arg3: memref<128x128xf32, #tpu.memory_space<vmem>>, %arg4: memref<8x128xf32, #tpu.memory_space<vmem>>, %arg5: memref<16x128xf32, #tpu.memory_space<vmem>>) attributes {dimension_semantics = [#tpu.dimension_semantics<parallel>], iteration_bounds = array<i64: 1>, scalar_prefetch = 0 : i64, scratch_operands = 0 : i64, tpu.core_type = #tpu.core_type<tc>, window_params = [{transform_indices = @transform_0, window_bounds = array<i64: 16, 128>}, {transform_indices = @transform_1, window_bounds = array<i64: 16, 128>}, {pipeline_mode = #tpu.pipeline_mode<synchronous>, transform_indices = @transform_2, window_bounds = array<i64: 128, 128>}, {pipeline_mode = #tpu.pipeline_mode<synchronous>, transform_indices = @transform_3, window_bounds = array<i64: 8, 128>}, {transform_indices = @transform_4, window_bounds = array<i64: 16, 128>}]} {
    %c0 = arith.constant 0 : index
    %c0_0 = arith.constant 0 : index
    %0 = vector.load %arg1[%c0, %c0_0] : memref<16x128xf32, #tpu.memory_space<vmem>>, vector<16x128xf32>
    %c0_1 = arith.constant 0 : index
    %c0_2 = arith.constant 0 : index
    %1 = vector.load %arg3[%c0_1, %c0_2] : memref<128x128xf32, #tpu.memory_space<vmem>>, vector<128x128xf32>
    %cst = arith.constant dense<0.000000e+00> : vector<16x128xf32>
    %2 = tpu.matmul %0, %1, %cst {dimension_numbers = #tpu.dot_dimension_numbers<[1], [0], [0], [1], [0, 0, 1, 1], [], []>} : vector<16x128xf32>, vector<128x128xf32>, vector<16x128xf32> -> vector<16x128xf32>
    %c0_3 = arith.constant 0 : index
    %c0_4 = arith.constant 0 : index
    %3 = vector.load %arg4[%c0_3, %c0_4] : memref<8x128xf32, #tpu.memory_space<vmem>>, vector<1x128xf32>
    %c1 = arith.constant 1 : index
    %c0_5 = arith.constant 0 : index
    %4 = vector.load %arg4[%c1, %c0_5] : memref<8x128xf32, #tpu.memory_space<vmem>>, vector<1x128xf32>
    %c2 = arith.constant 2 : index
    %c0_6 = arith.constant 0 : index
    %5 = vector.load %arg4[%c2, %c0_6] : memref<8x128xf32, #tpu.memory_space<vmem>>, vector<1x128xf32>
    %6 = vector.broadcast %3 : vector<1x128xf32> to vector<16x128xf32>
    %7 = arith.addf %2, %6 : vector<16x128xf32>
    %c0_7 = arith.constant 0 : index
    %c0_8 = arith.constant 0 : index
    %8 = vector.load %arg2[%c0_7, %c0_8] : memref<16x128xf32, #tpu.memory_space<vmem>>, vector<16x128xf32>
    %9 = arith.addf %7, %8 : vector<16x128xf32>
    %cst_9 = arith.constant dense<0.000000e+00> : vector<16xf32>
    %10 = vector.multi_reduction <add>, %9, %cst_9 [1] : vector<16x128xf32> to vector<16xf32>
    %11 = vector.shape_cast %10 : vector<16xf32> to vector<16x1xf32>
    %cst_10 = arith.constant 3.125000e-02 : f32
    %12 = vector.broadcast %cst_10 : f32 to vector<16x1xf32>
    %13 = arith.mulf %11, %12 : vector<16x1xf32>
    %14 = vector.broadcast %13 : vector<16x1xf32> to vector<16x128xf32>
    %15 = arith.subf %9, %14 : vector<16x128xf32>
    %16 = tpu.iota {dimensions = array<i32: 1>} : vector<1x128xi32>
    %c32_i32 = arith.constant 32 : i32
    %17 = vector.broadcast %c32_i32 : i32 to vector<1x128xi32>
    %18 = arith.cmpi slt, %16, %17 : vector<1x128xi32>
    %cst_11 = arith.constant 0.000000e+00 : f32
    %19 = vector.shape_cast %18 : vector<1x128xi1> to vector<1x128xi1>
    %20 = vector.broadcast %19 : vector<1x128xi1> to vector<16x128xi1>
    %21 = vector.broadcast %cst_11 : f32 to vector<16x128xf32>
    %22 = arith.select %20, %15, %21 : vector<16x128xi1>, vector<16x128xf32>
    %23 = arith.mulf %22, %22 : vector<16x128xf32>
    %cst_12 = arith.constant dense<0.000000e+00> : vector<16xf32>
    %24 = vector.multi_reduction <add>, %23, %cst_12 [1] : vector<16x128xf32> to vector<16xf32>
    %25 = vector.shape_cast %24 : vector<16xf32> to vector<16x1xf32>
    %cst_13 = arith.constant 3.125000e-02 : f32
    %26 = vector.broadcast %cst_13 : f32 to vector<16x1xf32>
    %27 = arith.mulf %25, %26 : vector<16x1xf32>
    %cst_14 = arith.constant 9.99999996E-13 : f32
    %28 = vector.broadcast %cst_14 : f32 to vector<16x1xf32>
    %29 = arith.addf %27, %28 : vector<16x1xf32>
    %30 = math.rsqrt %29 : vector<16x1xf32>
    %31 = vector.broadcast %30 : vector<16x1xf32> to vector<16x128xf32>
    %32 = arith.mulf %15, %31 : vector<16x128xf32>
    %33 = vector.broadcast %4 : vector<1x128xf32> to vector<16x128xf32>
    %34 = arith.mulf %32, %33 : vector<16x128xf32>
    %35 = vector.broadcast %5 : vector<1x128xf32> to vector<16x128xf32>
    %36 = arith.addf %34, %35 : vector<16x128xf32>
    %c0_15 = arith.constant 0 : index
    %c0_16 = arith.constant 0 : index
    %37 = vector.load %arg5[%c0_15, %c0_16] : memref<16x128xf32, #tpu.memory_space<vmem>>, vector<16x128xf32>
    tpu.vector_store %arg5[%c0_15, %c0_16], %36 {strides = array<i32>} : memref<16x128xf32, #tpu.memory_space<vmem>>, vector<16x128xf32>,
    return
  }
  func.func @transform_0(%arg0: i32) -> (i32, i32) {
    %c0_i32 = arith.constant 0 : i32
    %c0_i32_0 = arith.constant 0 : i32
    return %arg0, %c0_i32 : i32, i32
  }
  func.func @transform_1(%arg0: i32) -> (i32, i32) {
    %c0_i32 = arith.constant 0 : i32
    %c0_i32_0 = arith.constant 0 : i32
    return %arg0, %c0_i32 : i32, i32
  }
  func.func @transform_2(%arg0: i32) -> (i32, i32) {
    %c0_i32 = arith.constant 0 : i32
    %c0_i32_0 = arith.constant 0 : i32
    %c0_i32_1 = arith.constant 0 : i32
    return %c0_i32, %c0_i32_0 : i32, i32
  }
  func.func @transform_3(%arg0: i32) -> (i32, i32) {
    %c0_i32 = arith.constant 0 : i32
    %c0_i32_0 = arith.constant 0 : i32
    %c0_i32_1 = arith.constant 0 : i32
    return %c0_i32, %c0_i32_0 : i32, i32
  }
  func.func @transform_4(%arg0: i32) -> (i32, i32) {
    %c0_i32 = arith.constant 0 : i32
    %c0_i32_0 = arith.constant 0 : i32
    return %arg0, %c0_i32 : i32, i32
  }
}

</mosaic_0001>

<bundles_post_ra>
// kernel: tpu_custom_call.1
= control target key start
LH: loop header
LB: loop body
LE: loop exit
PB: predicated region body
PF: predicated region fallthrough
CT: control target
= control target key end

     0   :  { %9 = vsyncpa [#allocation3], 0  ;;  %s421_s0 = inlined_call_operand.hbm [shape: f32[16,128], index: 0, kind: input, shape index: {}]   ;;  %s422_s1 = inlined_call_operand.hbm [shape: f32[16,128], index: 1, kind: input, shape index: {}]   ;;  %s423_s2 = inlined_call_operand.hbm [shape: f32[128,128], index: 2, kind: input, shape index: {}]   ;;  %s424_s3 = inlined_call_operand.hbm [shape: f32[8,128], index: 3, kind: input, shape index: {}]   ;;  %s425_s4 = inlined_call_operand.hbm [shape: f32[16,128], index: 4, kind: output, shape index: {}]  }
   0x1   :  { %10 = vsyncpa [#allocation6], 0 }
   0x2   :  { %11 = vsyncpa [#allocation9], 0 }
   0x3   :  { %12 = vsyncpa [#allocation4], 0  ;;  %s30_s17 = sshll.u32 %s422_s1, 4  ;;  %s362_s18 = smov [#allocation5]   ;;  %s31_s17 = int_to_ptr.hbm [resolvable:$true] %s30_s17 }
   0x4   :  { %s32_s19 = sshll.u32 %s362_s18, 4  ;;  %s17_s22 = sshll.u32 %s421_s0, 4  ;;  %s33_s19 = int_to_ptr.vmem [resolvable:$true] %s32_s19  ;;  %s18_s22 = int_to_ptr.hbm [resolvable:$true] %s17_s22 }
   0x5   :  { %s363_s23 = smov 128   ;;  %s364_s24 = smov 8  }
   0x6   :  { %38 = dma.hbm_to_vmem [thread:$0]  %s31_s17, 256, %s33_s19, [#allocation6], %s363_s23, %s363_s23, %s364_s24  }
   0x7   :  { %s365_s25 = smov [#allocation2]   ;;  %s43_s1 = sshll.u32 %s423_s2, 4  ;;  %s44_s1 = int_to_ptr.hbm [resolvable:$true] %s43_s1 }
   0x8   :  { %s19_s26 = sshll.u32 %s365_s25, 4  ;;  %s57_s30 = sshll.u32 %s424_s3, 4  ;;  %s20_s26 = int_to_ptr.vmem [resolvable:$true] %s19_s26  ;;  %s58_s30 = int_to_ptr.hbm [resolvable:$true] %s57_s30 }
   0x9   :  { %25 = dma.hbm_to_vmem [thread:$0]  %s18_s22, 256, %s20_s26, [#allocation3], %s363_s23, %s363_s23, %s364_s24  }
   0xa   :  { %s366_s5 = smov [#allocation7]   ;;  %s367_s7 = smov [#allocation8]  }
   0xb   :  { %s45_s6 = sshll.u32 %s366_s5, 4  ;;  %s59_s2 = sshll.u32 %s367_s7, 4  ;;  %s46_s6 = int_to_ptr.vmem [resolvable:$true] %s45_s6  ;;  %s60_s2 = int_to_ptr.vmem [resolvable:$true] %s59_s2 }
   0xc   :  { %51 = dma.hbm_to_vmem [thread:$0]  %s44_s1, 2048, %s46_s6, [#allocation6], %s363_s23, %s363_s23, %s364_s24  }
   0xd   :  { %62 = dma.hbm_to_vmem [thread:$0]  %s58_s30, 128, %s60_s2, [#allocation9]  }
   0xe   :  { %354 = dma.done.wait [#allocation3], 256  }
   0xf   :  { %355 = vsyncadd [#allocation3], 4294967040 }
  0x10   :  { %356 = dma.done.wait [#allocation6], 2304  }
  0x11   :  { %357 = vsyncadd [#allocation6], 4294964992 }
  0x12   :  { %358 = dma.done.wait [#allocation9], 128  }
  0x13   :  { %359 = vsyncadd [#allocation9], 4294967168  ;;  %v96_v0 = vld [vmem:[#allocation7 + $0x78] sm:$0xff]  ;;  %v95_v1 = vld [vmem:[#allocation7 + $0x70] sm:$0xff]  ;;  %v136_v27 = vlaneseq  ;;  %s368_s3 = smov [#allocation10]   ;;  %s189_s11 = sshll.u32 %s425_s4, 4  ;;  %s190_s11 = int_to_ptr.hbm [resolvable:$true] %s189_s11 }
  0x14   :  { %101 = vmatpush.msra.mxu0 %v96_v0  ;;  %204 = vmatpush.msra.mxu1 %v96_v0  ;;  %v94_v2 = vld [vmem:[#allocation7 + $0x68] sm:$0xff]  ;;  %v93_v3 = vld [vmem:[#allocation7 + $0x60] sm:$0xff]  ;;  %v92_v4 = vld [vmem:[#allocation7 + $0x58] sm:$0xff]  ;;  %s187_s8 = sshll.u32 %s368_s3, 4  ;;  %s188_s8 = int_to_ptr.vmem [resolvable:$true] %s187_s8 }
  0x15   :  { %v91_v5 = vld [vmem:[#allocation7 + $0x50] sm:$0xff]  ;;  %v90_v6 = vld [vmem:[#allocation7 + $0x48] sm:$0xff]  ;;  %v89_v7 = vld [vmem:[#allocation7 + $0x40] sm:$0xff]  ;;  %v137_v28 = vand.u32 127, %v136_v27 }
  0x16   :  { %102 = vmatpush.msra.mxu0 %v95_v1  ;;  %205 = vmatpush.msra.mxu1 %v95_v1  ;;  %v88_v8 = vld [vmem:[#allocation7 + $0x38] sm:$0xff]  ;;  %v87_v9 = vld [vmem:[#allocation7 + $0x30] sm:$0xff]  ;;  %v86_v10 = vld [vmem:[#allocation7 + $0x28] sm:$0xff] }
  0x17   :  { %v85_v11 = vld [vmem:[#allocation7 + $0x20] sm:$0xff]  ;;  %v84_v12 = vld [vmem:[#allocation7 + $0x18] sm:$0xff]  ;;  %v83_v13 = vld [vmem:[#allocation7 + $0x10] sm:$0xff]  ;;  %vm138_vm0 = vcmp.lt.s32.totalorder %v137_v28, 32 }
  0x18   :  { %103 = vmatpush.msra.mxu0 %v94_v2  ;;  %206 = vmatpush.msra.mxu1 %v94_v2  ;;  %v82_v14 = vld [vmem:[#allocation7 + $0x8] sm:$0xff]  ;;  %v81_v15 = vld [vmem:[#allocation7] sm:$0xff]  ;;  %v124_v20 = vld [vmem:[#allocation5] sm:$0xff] }
  0x19   :  { %v79_v16 = vld [vmem:[#allocation2] sm:$0xff]  ;;  %v80_v17 = vld [vmem:[#allocation2 + $0x8] sm:$0xff]  ;;  %v125_v25 = vld [vmem:[#allocation5 + $0x8] sm:$0xff] }
  0x1a   :  { %104 = vmatpush.msra.mxu0 %v93_v3  ;;  %207 = vmatpush.msra.mxu1 %v93_v3  ;;  %v227_v18 = vld [vmem:[#allocation8] ss:$0 sm:$0xff]  ;;  %v228_v53 = vld [vmem:[#allocation8 + $0x1] ss:$0 sm:$0xff]  ;;  %v229_v57 = vld [vmem:[#allocation8 + $0x2] ss:$0 sm:$0xff] }
  0x1c   :  { %105 = vmatpush.msra.mxu0 %v92_v4  ;;  %208 = vmatpush.msra.mxu1 %v92_v4 }
  0x1e   :  { %106 = vmatpush.msra.mxu0 %v91_v5  ;;  %209 = vmatpush.msra.mxu1 %v91_v5 }
  0x20   :  { %107 = vmatpush.msra.mxu0 %v90_v6  ;;  %210 = vmatpush.msra.mxu1 %v90_v6 }
  0x22   :  { %108 = vmatpush.msra.mxu0 %v89_v7  ;;  %211 = vmatpush.msra.mxu1 %v89_v7 }
  0x24   :  { %109 = vmatpush.msra.mxu0 %v88_v8  ;;  %212 = vmatpush.msra.mxu1 %v88_v8 }
  0x26   :  { %110 = vmatpush.msra.mxu0 %v87_v9  ;;  %213 = vmatpush.msra.mxu1 %v87_v9 }
  0x28   :  { %111 = vmatpush.msra.mxu0 %v86_v10  ;;  %214 = vmatpush.msra.mxu1 %v86_v10 }
  0x2a   :  { %112 = vmatpush.msra.mxu0 %v85_v11  ;;  %215 = vmatpush.msra.mxu1 %v85_v11 }
  0x2c   :  { %113 = vmatpush.msra.mxu0 %v84_v12  ;;  %216 = vmatpush.msra.mxu1 %v84_v12 }
  0x2e   :  { %114 = vmatpush.msra.mxu0 %v83_v13  ;;  %217 = vmatpush.msra.mxu1 %v83_v13 }
  0x30   :  { %115 = vmatpush.msra.mxu0 %v82_v14  ;;  %218 = vmatpush.msra.mxu1 %v82_v14 }
  0x32   :  { %116 = vmatpush.msra.mxu0 %v81_v15  ;;  %219 = vmatpush.msra.mxu1 %v81_v15 }
  0x33   :  { %117 = vmatmul.f32.vlgmr.msra.gmra.mxu0 %v79_v16  ;;  %120 = vmatmul.f32.vlgmr.msra.gmra.mxu1 %v80_v17 }
  0xb0   :  { %v118_v19 = vpop.f32.mrf.mxu0  ;;  %v121_v22 = vpop.f32.mrf.mxu1 }
  0xb1   :  { %v119_v21 = vadd.f32 %v227_v18, %v118_v19  ;;  %v122_v24 = vadd.f32 %v227_v18, %v121_v22 }
  0xb3   :  { %v126_v23 = vadd.f32 %v124_v20, %v119_v21  ;;  %v127_v26 = vadd.f32 %v125_v25, %v122_v24 }
  0xb5   :  { %128 = vadd.xlane.f32.xlu0 %v126_v23 }
  0xbd   :  { %130 = vadd.xlane.f32.xlu0 %v127_v26 }
 0x128   :  { %v129_v29 = vpop.xlane.xlu0 %128 }
 0x129   :  { %v132_v30 = vmul.f32 0.03125, %v129_v29 }
 0x12b   :  { %v134_v31 = vsub.f32 %v126_v23, %v132_v30 }
 0x12d   :  { %v141_v32 = vsel %vm138_vm0, %v134_v31, 0.0 }
 0x12e   :  { %v143_v33 = vmul.f32 %v141_v32, %v141_v32 }
 0x130   :  { %145 = vadd.xlane.f32.xlu1 %v143_v33  ;;  %v131_v34 = vpop.xlane.xlu0 %130 }
 0x131   :  { %v133_v35 = vmul.f32 0.03125, %v131_v34 }
 0x133   :  { %v135_v36 = vsub.f32 %v127_v26, %v133_v35 }
 0x135   :  { %v142_v37 = vsel %vm138_vm0, %v135_v36, 0.0 }
 0x136   :  { %v144_v38 = vmul.f32 %v142_v37, %v142_v37 }
 0x138   :  { %147 = vadd.xlane.f32.xlu1 %v144_v38 }
 0x1a3   :  { %v146_v39 = vpop.xlane.xlu1 %145 }
 0x1a4   :  { %v149_v40 = vmul.f32 0.03125, %v146_v39 }
 0x1a6   :  { %v151_v41 = vadd.f32 1e-12, %v149_v40 }
 0x1a8   :  { %230 = vrsqrt.f32 %v151_v41  ;;  %vm159_vm2 = vweird.f32 %v151_v41 }
 0x1ab   :  { %v148_v42 = vpop.xlane.xlu1 %147 }
 0x1ac   :  { %v150_v43 = vmul.f32 0.03125, %v148_v42 }
 0x1ae   :  { %v231_v44 = vpop.eup %230  ;;  %v152_v45 = vadd.f32 1e-12, %v150_v43 }
 0x1af   :  { %v154_v46 = vmul.f32 %v231_v44, %v151_v41  ;;  %vm160_vm1 = vweird.f32 %v231_v44 }
 0x1b0   :  { %232 = vrsqrt.f32 %v152_v45  ;;  %vm161_vm3 = vmor %vm159_vm2, %vm160_vm1  ;;  %vm169_vm5 = vweird.f32 %v152_v45 }
 0x1b1   :  { %v155_v47 = vmul.f32 %v231_v44, %v154_v46 }
 0x1b3   :  { %v156_v48 = vmul.f32 0.5, %v155_v47 }
 0x1b5   :  { %v157_v49 = vsub.f32 1.5, %v156_v48 }
 0x1b6   :  { %v233_v50 = vpop.eup %232 }
 0x1b7   :  { %v158_v51 = vmul.f32 %v231_v44, %v157_v49  ;;  %v164_v52 = vmul.f32 %v233_v50, %v152_v45  ;;  %vm170_vm4 = vweird.f32 %v233_v50 }
 0x1b8   :  { %vm171_vm6 = vmor %vm169_vm5, %vm170_vm4 }
 0x1b9   :  { %v162_v54 = vsel %vm161_vm3, %v231_v44, %v158_v51  ;;  %v165_v55 = vmul.f32 %v233_v50, %v164_v52 }
 0x1ba   :  { %v173_v56 = vmul.f32 %v162_v54, %v134_v31 }
 0x1bb   :  { %v166_v58 = vmul.f32 0.5, %v165_v55 }
 0x1bc   :  { %v176_v59 = vmul.f32 %v228_v53, %v173_v56 }
 0x1bd   :  { %v167_v60 = vsub.f32 1.5, %v166_v58 }
 0x1be   :  { %v179_v61 = vadd.f32 %v229_v57, %v176_v59 }
 0x1bf   :  { %v168_v62 = vmul.f32 %v233_v50, %v167_v60 }
 0x1c0   :  { %181 = vst [vmem:[#allocation10] sm:$0xff] %v179_v61 }
 0x1c1   :  { %v172_v63 = vsel %vm171_vm6, %v233_v50, %v168_v62 }
 0x1c2   :  { %v174_v0 = vmul.f32 %v172_v63, %v135_v36 }
 0x1c4   :  { %v177_v1 = vmul.f32 %v228_v53, %v174_v0 }
 0x1c6   :  { %v180_v2 = vadd.f32 %v229_v57, %v177_v1 }
 0x1c8   :  { %182 = vst [vmem:[#allocation10 + $0x8] sm:$0xff] %v180_v2 }
 0x1c9   :  { %195 = dma.vmem_to_hbm [thread:$0]  %s188_s8, 256, %s190_s11, [#allocation4], %s363_s23, %s363_s23, %s364_s24  }
 0x1ca   :  { %360 = dma.done.wait [#allocation4], 256  }
 0x1cb   :  { %361 = vsyncadd [#allocation4], 4294967040 }
 0x1cc   :  { %200 = vsyncpa [#allocation3], 1 }
 0x1cd   :  { %201 = vsyncpa [#allocation6], 1 }
 0x1ce   :  { %202 = vsyncpa [#allocation9], 1 }
 0x1cf   :  { %203 = vsyncpa [#allocation4], 1 }

</bundles_post_ra>
